<compile_context>
chip_gen: v7x
topology: tpu7x:2x2x1
jax: 0.10.0
libtpu: 0.0.40
codegen_flags: <defaults>
</compile_context>

<pallas_src>
import functools

import jax
import jax.numpy as jnp
from jax.experimental import pallas as pl
from jax.experimental.pallas import tpu as pltpu

LANE = 128


def _round_up(x, m):
    return pl.cdiv(x, m) * m


def _choose_tile(n, tile_n):
    """Row-tile selection (validates/clamps tile_n; see header comments)."""
    # Multiple of 256 (MXU / bf16 sublane packing); <= 4096 keeps the
    # double-buffered blocks + f32 intermediates inside v5e's 16 MiB default
    # scoped-VMEM limit (and far inside v7x's 64 MiB physical VMEM).
    tile_n = max(256, min(4096, _round_up(int(tile_n), 256)))
    if n >= 2 * tile_n:
        return tile_n
    if n >= 512:
        # >= 2 grid steps so v7x's two TensorCores both get work.
        return min(tile_n, _round_up(pl.cdiv(n, 2), 256))
    # Tiny batches: a single block (multiple of 16 for bf16 intermediates).
    return _round_up(n, 16)


def _equi_mlp_kernel(x_ref, w0_ref, b0_ref, w1_ref, b1_ref, w2_ref, b2_ref,
                     o_ref):
    # Cast x to bf16 in-kernel (x stays in its native dtype in HBM).
    x = x_ref[...].astype(jnp.bfloat16)
    # fc0: in -> hid (bf16 MXU, f32 accumulate), bias + ReLU in f32.
    h = jnp.dot(x, w0_ref[...], preferred_element_type=jnp.float32) + b0_ref[...]
    h = jnp.maximum(h, 0.0).astype(jnp.bfloat16)
    # fc1: hid -> hid.
    h = jnp.dot(h, w1_ref[...], preferred_element_type=jnp.float32) + b1_ref[...]
    h = jnp.maximum(h, 0.0).astype(jnp.bfloat16)
    # fc2: hid -> out, no activation (last layer of EquiMlp).
    out = jnp.dot(h, w2_ref[...], preferred_element_type=jnp.float32) + b2_ref[...]
    # Lane-dense transposed store: (tile, out_p) -> (out_p, tile) on the XLU,
    # keep only the valid (rounded-to-8) output channels as sublanes, f32.
    out_rows = o_ref.shape[0]
    o_ref[...] = out.T[:out_rows, :].astype(o_ref.dtype)


def equi_mlp_pallas(x_flat, params, out_size, tile_n=2048):
    """x_flat: (N, in_size) native dtype. params: lane-padded bf16 W / f32 b.

    Returns the transposed result (round_up(out_size, 8), N_pad) in f32; the
    caller slices the valid out_size rows / N columns and transposes back.
    """
    w0, b0, w1, b1, w2, b2 = params
    n, in_size = x_flat.shape
    hid_p = w0.shape[1]
    out_p = w2.shape[1]
    out_rows = _round_up(out_size, 8)

    tile = _choose_tile(n, tile_n)
    grid = (pl.cdiv(n, tile),)
    n_pad = grid[0] * tile

    weight_bytes = sum(int(a.size) * a.dtype.itemsize for a in params)
    cost = pl.CostEstimate(
        flops=int(2 * n_pad * (in_size * hid_p + hid_p * hid_p + hid_p * out_p)),
        transcendentals=0,
        bytes_accessed=int(n * in_size * x_flat.dtype.itemsize
                           + out_rows * n_pad * 4 + weight_bytes),
    )

    return pl.pallas_call(
        _equi_mlp_kernel,
        out_shape=jax.ShapeDtypeStruct((out_rows, n_pad), jnp.float32),
        grid_spec=pltpu.PrefetchScalarGridSpec(
            num_scalar_prefetch=0,
            grid=grid,
            in_specs=[
                # x: native dtype, row-tiled.  The last (partial) block may
                # read undefined rows past N; their outputs are sliced off.
                pl.BlockSpec((tile, in_size), lambda i: (i, 0)),
                # Weights / biases: constant index_map -> fetched once and
                # kept VMEM-resident across all grid steps.
                pl.BlockSpec((in_size, hid_p), lambda i: (0, 0)),
                pl.BlockSpec((1, hid_p), lambda i: (0, 0)),
                pl.BlockSpec((hid_p, hid_p), lambda i: (0, 0)),
                pl.BlockSpec((1, hid_p), lambda i: (0, 0)),
                pl.BlockSpec((hid_p, out_p), lambda i: (0, 0)),
                pl.BlockSpec((1, out_p), lambda i: (0, 0)),
            ],
            # Transposed output: batch on the lane axis -> lane-dense stores.
            out_specs=pl.BlockSpec((out_rows, tile), lambda i: (0, i)),
        ),
        compiler_params=pltpu.CompilerParams(
            dimension_semantics=("parallel",)),
        cost_estimate=cost,
    )(x_flat, w0, b0, w1, b1, w2, b2)


@functools.partial(jax.jit, static_argnames=("in_size", "out_size", "tile_n"))
def equi_mlp_forward(x, params, in_size, out_size, tile_n=2048):
    """Reproduces EquiMlp.forward reshape semantics (jitted end-to-end)."""
    dim_0 = x.shape[0]
    x_flat = x.reshape((-1, in_size))        # (-1, in_size, 1, 1) with H=W=1
    n = x_flat.shape[0]
    out_t = equi_mlp_pallas(x_flat, params, out_size, tile_n)
    # Undo the transposed layout on the tiny (out_rows, N) result; the slice,
    # transpose-back and cast fuse into one small copy under jit.
    y = out_t[:out_size, :n].T.astype(x.dtype)
    if dim_0 == 1:
        return y.reshape(1, out_size)
    return y.reshape(dim_0, -1, out_size)


def prepare_params(w0, b0, w1, b1, w2, b2):
    """Pad lane dims to multiples of 128 and cast weights to bf16.

    Padded weight rows/columns and bias entries are zero, so padded hidden /
    output channels stay exactly zero through ReLU and are sliced off in the
    wrapper -- numerics of the valid channels are unchanged.
    """
    in_size, hid = w0.shape
    out = w2.shape[1]
    hid_p = _round_up(hid, LANE)
    out_p = _round_up(out, LANE)

    def pad2(a, rows, cols):
        return jnp.pad(a, ((0, rows - a.shape[0]), (0, cols - a.shape[1])))

    w0p = pad2(w0, in_size, hid_p).astype(jnp.bfloat16)
    w1p = pad2(w1, hid_p, hid_p).astype(jnp.bfloat16)
    w2p = pad2(w2, hid_p, out_p).astype(jnp.bfloat16)
    b0p = pad2(b0, 1, hid_p).astype(jnp.float32)
    b1p = pad2(b1, 1, hid_p).astype(jnp.float32)
    b2p = pad2(b2, 1, out_p).astype(jnp.float32)
    return (w0p, b0p, w1p, b1p, w2p, b2p)


def init_params(key, in_size, hid_size, out_size):
    """Deterministic synthetic weights for depth=3 EquiMlp (f32, unpadded).

    R2Conv(kernel_size=1) weights are (out_ch, in_ch, 1, 1) + bias (out_ch);
    we store the transposed (in_ch, out_ch) matrices for channels-last matmul.
    """
    k0, k1, k2, k3, k4, k5 = jax.random.split(key, 6)
    scale = 0.1
    w0 = scale * jax.random.normal(k0, (in_size, hid_size), jnp.float32)
    b0 = scale * jax.random.normal(k1, (1, hid_size), jnp.float32)
    w1 = scale * jax.random.normal(k2, (hid_size, hid_size), jnp.float32)
    b1 = scale * jax.random.normal(k3, (1, hid_size), jnp.float32)
    w2 = scale * jax.random.normal(k4, (hid_size, out_size), jnp.float32)
    b2 = scale * jax.random.normal(k5, (1, out_size), jnp.float32)
    # TODO(synk): true e2cnn R2Conv weights are constrained to the group
    # equivariance basis; here we use unconstrained dense weights.
    return (w0, b0, w1, b1, w2, b2)


if __name__ == "__main__":
    # Small shapes: dim_0=2, seq=4, in_type.size=16, hid_type.size=32,
    # out_type.size=8  (depth=3: in->hid, hid->hid, hid->out).
    in_size, hid_size, out_size = 16, 32, 8
    key = jax.random.PRNGKey(0)
    kx, kp = jax.random.split(key)
    x = jax.random.normal(kx, (2, 4, in_size), jnp.float32)

    raw_params = init_params(kp, in_size, hid_size, out_size)
    params = prepare_params(*raw_params)

    y = equi_mlp_forward(x, params, in_size, out_size)
    y = jax.block_until_ready(y)

    # Pure-JAX f32 reference; kernel uses bf16 matmul operands with f32
    # accumulation (output is f32), so use a looser tolerance.
    w0, b0, w1, b1, w2, b2 = raw_params
    h = jnp.maximum(x.reshape(-1, in_size) @ w0 + b0, 0.0)
    h = jnp.maximum(h @ w1 + b1, 0.0)
    ref = (h @ w2 + b2).reshape(2, -1, out_size)
    assert y.shape == (2, 4, out_size), y.shape
    assert jnp.allclose(y, ref, atol=2e-2, rtol=2e-2), (
        float(jnp.max(jnp.abs(y - ref))))

    print("KERNEL_OK")
</pallas_src>

<mosaic_0001>
module attributes {stable_mosaic.version = 11 : i64} {
  func.func @_equi_mlp_kernel(%arg0: i32, %arg1: memref<16x16xf32, #tpu.memory_space<vmem>>, %arg2: memref<16x128xbf16, #tpu.memory_space<vmem>>, %arg3: memref<1x128xf32, #tpu.memory_space<vmem>>, %arg4: memref<128x128xbf16, #tpu.memory_space<vmem>>, %arg5: memref<1x128xf32, #tpu.memory_space<vmem>>, %arg6: memref<128x128xbf16, #tpu.memory_space<vmem>>, %arg7: memref<1x128xf32, #tpu.memory_space<vmem>>, %arg8: memref<8x16xf32, #tpu.memory_space<vmem>>) attributes {dimension_semantics = [#tpu.dimension_semantics<parallel>], iteration_bounds = array<i64: 1>, scalar_prefetch = 0 : i64, scratch_operands = 0 : i64, tpu.core_type = #tpu.core_type<tc>, window_params = [{transform_indices = @transform_0, window_bounds = array<i64: 16, 16>}, {pipeline_mode = #tpu.pipeline_mode<synchronous>, transform_indices = @transform_1, window_bounds = array<i64: 16, 128>}, {pipeline_mode = #tpu.pipeline_mode<synchronous>, transform_indices = @transform_2, window_bounds = array<i64: 1, 128>}, {pipeline_mode = #tpu.pipeline_mode<synchronous>, transform_indices = @transform_3, window_bounds = array<i64: 128, 128>}, {pipeline_mode = #tpu.pipeline_mode<synchronous>, transform_indices = @transform_4, window_bounds = array<i64: 1, 128>}, {pipeline_mode = #tpu.pipeline_mode<synchronous>, transform_indices = @transform_5, window_bounds = array<i64: 128, 128>}, {pipeline_mode = #tpu.pipeline_mode<synchronous>, transform_indices = @transform_6, window_bounds = array<i64: 1, 128>}, {transform_indices = @transform_7, window_bounds = array<i64: 8, 16>}]} {
    %c0 = arith.constant 0 : index
    %c0_0 = arith.constant 0 : index
    %0 = vector.load %arg1[%c0, %c0_0] : memref<16x16xf32, #tpu.memory_space<vmem>>, vector<16x16xf32>
    %1 = arith.truncf %0 : vector<16x16xf32> to vector<16x16xbf16>
    %c0_1 = arith.constant 0 : index
    %c0_2 = arith.constant 0 : index
    %2 = vector.load %arg2[%c0_1, %c0_2] : memref<16x128xbf16, #tpu.memory_space<vmem>>, vector<16x128xbf16>
    %cst = arith.constant dense<0.000000e+00> : vector<16x128xf32>
    %3 = tpu.matmul %1, %2, %cst {dimension_numbers = #tpu.dot_dimension_numbers<[1], [0], [0], [1], [0, 0, 1, 1], [], []>} : vector<16x16xbf16>, vector<16x128xbf16>, vector<16x128xf32> -> vector<16x128xf32>
    %c0_3 = arith.constant 0 : index
    %c0_4 = arith.constant 0 : index
    %4 = vector.load %arg3[%c0_3, %c0_4] : memref<1x128xf32, #tpu.memory_space<vmem>>, vector<1x128xf32>
    %5 = vector.broadcast %4 : vector<1x128xf32> to vector<16x128xf32>
    %6 = arith.addf %3, %5 : vector<16x128xf32>
    %cst_5 = arith.constant 0.000000e+00 : f32
    %7 = vector.broadcast %cst_5 : f32 to vector<16x128xf32>
    %8 = arith.maximumf %6, %7 : vector<16x128xf32>
    %9 = arith.truncf %8 : vector<16x128xf32> to vector<16x128xbf16>
    %c0_6 = arith.constant 0 : index
    %c0_7 = arith.constant 0 : index
    %10 = vector.load %arg4[%c0_6, %c0_7] : memref<128x128xbf16, #tpu.memory_space<vmem>>, vector<128x128xbf16>
    %cst_8 = arith.constant dense<0.000000e+00> : vector<16x128xf32>
    %11 = tpu.matmul %9, %10, %cst_8 {dimension_numbers = #tpu.dot_dimension_numbers<[1], [0], [0], [1], [0, 0, 1, 1], [], []>} : vector<16x128xbf16>, vector<128x128xbf16>, vector<16x128xf32> -> vector<16x128xf32>
    %c0_9 = arith.constant 0 : index
    %c0_10 = arith.constant 0 : index
    %12 = vector.load %arg5[%c0_9, %c0_10] : memref<1x128xf32, #tpu.memory_space<vmem>>, vector<1x128xf32>
    %13 = vector.broadcast %12 : vector<1x128xf32> to vector<16x128xf32>
    %14 = arith.addf %11, %13 : vector<16x128xf32>
    %cst_11 = arith.constant 0.000000e+00 : f32
    %15 = vector.broadcast %cst_11 : f32 to vector<16x128xf32>
    %16 = arith.maximumf %14, %15 : vector<16x128xf32>
    %17 = arith.truncf %16 : vector<16x128xf32> to vector<16x128xbf16>
    %c0_12 = arith.constant 0 : index
    %c0_13 = arith.constant 0 : index
    %18 = vector.load %arg6[%c0_12, %c0_13] : memref<128x128xbf16, #tpu.memory_space<vmem>>, vector<128x128xbf16>
    %cst_14 = arith.constant dense<0.000000e+00> : vector<16x128xf32>
    %19 = tpu.matmul %17, %18, %cst_14 {dimension_numbers = #tpu.dot_dimension_numbers<[1], [0], [0], [1], [0, 0, 1, 1], [], []>} : vector<16x128xbf16>, vector<128x128xbf16>, vector<16x128xf32> -> vector<16x128xf32>
    %c0_15 = arith.constant 0 : index
    %c0_16 = arith.constant 0 : index
    %20 = vector.load %arg7[%c0_15, %c0_16] : memref<1x128xf32, #tpu.memory_space<vmem>>, vector<1x128xf32>
    %21 = vector.broadcast %20 : vector<1x128xf32> to vector<16x128xf32>
    %22 = arith.addf %19, %21 : vector<16x128xf32>
    %23 = tpu.transpose %22, [1, 0] : vector<16x128xf32> -> vector<128x16xf32>
    %24 = vector.extract_strided_slice %23 {offsets = [0, 0], sizes = [8, 16], strides = [1, 1]} : vector<128x16xf32> to vector<8x16xf32>
    %c0_17 = arith.constant 0 : index
    %c0_18 = arith.constant 0 : index
    %25 = vector.load %arg8[%c0_17, %c0_18] : memref<8x16xf32, #tpu.memory_space<vmem>>, vector<8x16xf32>
    tpu.vector_store %arg8[%c0_17, %c0_18], %24 {strides = array<i32>} : memref<8x16xf32, #tpu.memory_space<vmem>>, vector<8x16xf32>,
    return
  }
  func.func @transform_0(%arg0: i32) -> (i32, i32) {
    %c0_i32 = arith.constant 0 : i32
    %c0_i32_0 = arith.constant 0 : i32
    return %arg0, %c0_i32 : i32, i32
  }
  func.func @transform_1(%arg0: i32) -> (i32, i32) {
    %c0_i32 = arith.constant 0 : i32
    %c0_i32_0 = arith.constant 0 : i32
    %c0_i32_1 = arith.constant 0 : i32
    return %c0_i32, %c0_i32_0 : i32, i32
  }
  func.func @transform_2(%arg0: i32) -> (i32, i32) {
    %c0_i32 = arith.constant 0 : i32
    %c0_i32_0 = arith.constant 0 : i32
    %c0_i32_1 = arith.constant 0 : i32
    return %c0_i32, %c0_i32_0 : i32, i32
  }
  func.func @transform_3(%arg0: i32) -> (i32, i32) {
    %c0_i32 = arith.constant 0 : i32
    %c0_i32_0 = arith.constant 0 : i32
    %c0_i32_1 = arith.constant 0 : i32
    return %c0_i32, %c0_i32_0 : i32, i32
  }
  func.func @transform_4(%arg0: i32) -> (i32, i32) {
    %c0_i32 = arith.constant 0 : i32
    %c0_i32_0 = arith.constant 0 : i32
    %c0_i32_1 = arith.constant 0 : i32
    return %c0_i32, %c0_i32_0 : i32, i32
  }
  func.func @transform_5(%arg0: i32) -> (i32, i32) {
    %c0_i32 = arith.constant 0 : i32
    %c0_i32_0 = arith.constant 0 : i32
    %c0_i32_1 = arith.constant 0 : i32
    return %c0_i32, %c0_i32_0 : i32, i32
  }
  func.func @transform_6(%arg0: i32) -> (i32, i32) {
    %c0_i32 = arith.constant 0 : i32
    %c0_i32_0 = arith.constant 0 : i32
    %c0_i32_1 = arith.constant 0 : i32
    return %c0_i32, %c0_i32_0 : i32, i32
  }
  func.func @transform_7(%arg0: i32) -> (i32, i32) {
    %c0_i32 = arith.constant 0 : i32
    %c0_i32_0 = arith.constant 0 : i32
    return %c0_i32, %arg0 : i32, i32
  }
}

</mosaic_0001>

<bundles_post_ra>
// kernel: equi_mlp_forward.1
= control target key start
LH: loop header
LB: loop body
LE: loop exit
PB: predicated region body
PF: predicated region fallthrough
CT: control target
= control target key end

     0   :  { %12 = vsyncpa [#allocation3], 0  ;;  %s774_s0 = inlined_call_operand.hbm [shape: f32[8,16], index: 0, kind: input, shape index: {}]   ;;  %s775_s1 = inlined_call_operand.hbm [shape: bf16[16,128], index: 1, kind: input, shape index: {}]   ;;  %s776_s2 = inlined_call_operand.vmem [shape: f32[1,128], index: 2, kind: input, shape index: {}]   ;;  %s777_s3 = inlined_call_operand.hbm [shape: bf16[128,128], index: 3, kind: input, shape index: {}]   ;;  %s778_s4 = inlined_call_operand.vmem [shape: f32[1,128], index: 4, kind: input, shape index: {}]   ;;  %s779_s5 = inlined_call_operand.hbm [shape: bf16[128,128], index: 5, kind: input, shape index: {}]   ;;  %s780_s6 = inlined_call_operand.vmem [shape: f32[1,128], index: 6, kind: input, shape index: {}]   ;;  %s781_s7 = inlined_call_operand.vmem [shape: f32[8,16], index: 7, kind: output, shape index: {}]  }
   0x1   :  { %13 = vsyncpa [#allocation5], 0 }
   0x2   :  { %14 = vsyncpa [#allocation8], 0 }
   0x3   :  { %19 = vsyncadd [#allocation3], 128  ;;  %s623_s24 = smov [#allocation4]   ;;  %s529_s28 = scalar_lea.hbm %s775_s1, 128 }
   0x4   :  { %s32_s25 = sshll.u32 %s623_s24, 4  ;;  %p530_p0 = scmp.ne.s32.totalorder %s775_s1, %s529_s28  ;;  %s33_s25 = int_to_ptr.vmem [resolvable:$true] %s32_s25 }
   0x5   :  { %p533_p1 = scmp.lt.u32.totalorder %s529_s28, %s775_s1 }
   0x7   :  { %p535_p2 = pnand %p533_p1, %p530_p0 }
   0x9   :  { %538 = shalt.err (!%p535_p2)
}
   0xa   :  { %s539_s10 = scalar_lea.vmem %s33_s25, 128  ;;  %p544_p4 = scmp.lt.s32.totalorder %s33_s25, %s33_s25 }
   0xb   :  { %p540_p3 = scmp.ne.s32.totalorder %s33_s25, %s539_s10  ;;  %p545_p5 = scmp.lt.s32.totalorder %s539_s10, %s539_s10 }
   0xd   :  { %p546_p6 = por %p545_p5, %p544_p4 }
   0xf   :  { %p547_p7 = pnand %p546_p6, %p540_p3 }
  0x11   :  { %550 = shalt.err (!%p547_p7)
}
  0x12   :  { %s624_s11 = smov 64   ;;  %s625_s12 = smov 4  }
  0x13   :  { %38 = dma.hbm_to_vmem [thread:$0]  %s775_s1, 128, %s33_s25, [#allocation5], %s624_s11, %s624_s11, %s625_s12  }
  0x14   :  { %s626_s15 = smov [#allocation2]   ;;  %s551_s19 = scalar_lea.hbm %s774_s0, 128 }
  0x15   :  { %s20_s16 = sshll.u32 %s626_s15, 4  ;;  %p552_p8 = scmp.ne.s32.totalorder %s774_s0, %s551_s19  ;;  %s21_s16 = int_to_ptr.vmem [resolvable:$true] %s20_s16 }
  0x16   :  { %p555_p9 = scmp.lt.u32.totalorder %s551_s19, %s774_s0 }
  0x18   :  { %p557_p10 = pnand %p555_p9, %p552_p8 }
  0x1a   :  { %560 = shalt.err (!%p557_p10)
}
  0x1b   :  { %s561_s24 = scalar_lea.vmem %s21_s16, 128  ;;  %s565_s1 = scalar_lea.vmem %s21_s16, 256 }
  0x1c   :  { %p562_p11 = scmp.ne.s32.totalorder %s21_s16, %s561_s24  ;;  %p566_p12 = scmp.lt.s32.totalorder %s21_s16, %s21_s16 }
  0x1d   :  { %p567_p13 = scmp.lt.s32.totalorder %s565_s1, %s561_s24 }
  0x1f   :  { %p568_p0 = por %p567_p13, %p566_p12 }
  0x21   :  { %p569_p1 = pnand %p568_p0, %p562_p11 }
  0x23   :  { %572 = shalt.err (!%p569_p1)
}
  0x24   :  { %s627_s25 = smov 128   ;;  %s628_s26 = smov 8  }
  0x25   :  { %26 = dma.hbm_to_vmem [thread:$0]  %s774_s0, 128, %s21_s16, [#allocation3], %s627_s25, %s627_s25, %s628_s26  }
  0x26   :  { %s629_s29 = smov [#allocation6]   ;;  %s630_s8 = smov [#allocation7]  }
  0x27   :  { %s46_s30 = sshll.u32 %s629_s29, 4  ;;  %s60_s9 = sshll.u32 %s630_s8, 4  ;;  %s47_s30 = int_to_ptr.vmem [resolvable:$true] %s46_s30  ;;  %s700_s9 = int_to_ptr.vmem [resolvable:$true] %s60_s9 }
  0x28   :  { %s573_s14 = scalar_lea.hbm %s777_s3, 1024 }
  0x29   :  { %p574_p2 = scmp.ne.s32.totalorder %s777_s3, %s573_s14  ;;  %p577_p3 = scmp.lt.u32.totalorder %s573_s14, %s777_s3 }
  0x2b   :  { %p579_p4 = pnand %p577_p3, %p574_p2 }
  0x2d   :  { %582 = shalt.err (!%p579_p4)
}
  0x2e   :  { %s583_s0 = scalar_lea.vmem %s47_s30, 1024  ;;  %p588_p6 = scmp.lt.s32.totalorder %s47_s30, %s47_s30 }
  0x2f   :  { %p584_p5 = scmp.ne.s32.totalorder %s47_s30, %s583_s0  ;;  %p589_p7 = scmp.lt.s32.totalorder %s583_s0, %s583_s0 }
  0x31   :  { %p590_p8 = por %p589_p7, %p588_p6 }
  0x33   :  { %p591_p9 = pnand %p590_p8, %p584_p5 }
  0x35   :  { %594 = shalt.err (!%p591_p9)
}
  0x36   :  { %52 = dma.hbm_to_vmem [thread:$0]  %s777_s3, 1024, %s47_s30, [#allocation5], %s624_s11, %s624_s11, %s625_s12  }
  0x37   :  { %s595_s23 = scalar_lea.hbm %s779_s5, 1024 }
  0x38   :  { %p596_p10 = scmp.ne.s32.totalorder %s779_s5, %s595_s23  ;;  %p599_p11 = scmp.lt.u32.totalorder %s595_s23, %s779_s5 }
  0x3a   :  { %p601_p12 = pnand %p599_p11, %p596_p10 }
  0x3c   :  { %604 = shalt.err (!%p601_p12)
}
  0x3d   :  { %s605_s27 = scalar_lea.vmem %s700_s9, 1024  ;;  %p610_p0 = scmp.lt.s32.totalorder %s700_s9, %s700_s9 }
  0x3e   :  { %p606_p13 = scmp.ne.s32.totalorder %s700_s9, %s605_s27  ;;  %p611_p1 = scmp.lt.s32.totalorder %s605_s27, %s605_s27 }
  0x40   :  { %p612_p2 = por %p611_p1, %p610_p0 }
  0x42   :  { %p613_p3 = pnand %p612_p2, %p606_p13 }
  0x44   :  { %616 = shalt.err (!%p613_p3)
}
  0x45   :  { %66 = dma.hbm_to_vmem [thread:$0]  %s779_s5, 1024, %s700_s9, [#allocation8], %s624_s11, %s624_s11, %s625_s12  }
  0x46   :  { %617 = dma.done.wait [#allocation3], 256  }
  0x47   :  { %618 = vsyncadd [#allocation3], 4294967040 }
  0x48   :  { %619 = dma.done.wait [#allocation5], 1152  }
  0x49   :  { %620 = vsyncadd [#allocation5], 4294966144 }
  0x4a   :  { %621 = dma.done.wait [#allocation8], 1024  }
  0x4b   :  { %622 = vsyncadd [#allocation8], 4294966272  ;;  %v631_v0 = vmov 0.0   ;;  %vm632_vm0 = vmmov 0   ;;  %v512_v1 = vld [vmem:[#allocation4] sm:$0xff]   ;;  %v82_v2 = vld [vmem:[#allocation2] sm:$0xff] }
  0x4c   :  { %456 = vmatprep.subr.bf16.mxu0 %v631_v0  ;;  %458 = vmatprep.mubr.msk.bf16.mxu0 %vm632_vm0, %v631_v0  ;;  %v83_v3 = vld [vmem:[#allocation2 + $0x8] sm:$0xff]  ;;  %vm100_vm1 = vcmask 130048   ;;  %v513_v5 = vld [vmem:[#allocation6] sm:$0xff]   ;;  %v514_v6 = vld [vmem:[#allocation6 + $0x8] sm:$0xff]  }
  0x4d   :  { %462 = vmatprep.subr.bf16.mxu1 %v631_v0  ;;  %478 = vmatprep.mubr.msk.bf16.mxu1 %vm632_vm0, %v631_v0  ;;  %v84_v4 = vpack.c.bf16 %v83_v3, %v82_v2  ;;  %v515_v7 = vld [vmem:[#allocation6 + $0x10] sm:$0xff]   ;;  %v516_v8 = vld [vmem:[#allocation6 + $0x18] sm:$0xff]   ;;  %v517_v9 = vld [vmem:[#allocation6 + $0x20] sm:$0xff]  }
  0x4e   :  { %457 = vmatpush3.bf16.msra.mxu0 %v512_v1  ;;  %463 = vmatpush3.bf16.msra.mxu1 %v513_v5  ;;  %v518_v10 = vld [vmem:[#allocation6 + $0x28] sm:$0xff]   ;;  %v519_v11 = vld [vmem:[#allocation6 + $0x30] sm:$0xff]   ;;  %v520_v12 = vld [vmem:[#allocation6 + $0x38] sm:$0xff]  }
  0x4f   :  { %482 = vmatprep.subr.bf16.mxu0 %v631_v0  ;;  %464 = vmatprep.subr.bf16.mxu1 %v631_v0  ;;  %v521_v13 = vld [vmem:[#allocation7] sm:$0xff]   ;;  %v522_v14 = vld [vmem:[#allocation7 + $0x8] sm:$0xff]   ;;  %v523_v15 = vld [vmem:[#allocation7 + $0x10] sm:$0xff]  }
  0x50   :  { %v524_v16 = vld [vmem:[#allocation7 + $0x18] sm:$0xff]   ;;  %v525_v17 = vld [vmem:[#allocation7 + $0x20] sm:$0xff]   ;;  %v526_v18 = vld [vmem:[#allocation7 + $0x28] sm:$0xff]  }
  0x51   :  { %459 = vmatmul.mubr.msk.bf16.vlgmr.msra.gmra.mrb[0].mxu0 %vm100_vm1, %v84_v4  ;;  %v415_v19 = vld [vmem:[%s776_s2] ss:$0 sm:$0xff]  ;;  %v527_v29 = vld [vmem:[#allocation7 + $0x30] sm:$0xff]   ;;  %v528_v30 = vld [vmem:[#allocation7 + $0x38] sm:$0xff]  }
  0x52   :  { %498 = vmatprep.mubr.msk.bf16.mxu0 %vm632_vm0, %v631_v0  ;;  %465 = vmatpush3.bf16.msra.mxu1 %v514_v6  ;;  %v418_v31 = vld [vmem:[%s778_s4] ss:$0 sm:$0xff] }
  0x53   :  { %466 = vmatprep.subr.bf16.mxu1 %v631_v0  ;;  %483 = vmatpush3.bf16.msra.mxu0 %v521_v13  ;;  %v427_v41 = vld [vmem:[%s780_s6] ss:$0 sm:$0xff] }
  0x54   :  { %484 = vmatprep.subr.bf16.mxu0 %v631_v0 }
  0x56   :  { %467 = vmatpush3.bf16.msra.mxu1 %v515_v7 }
  0x57   :  { %468 = vmatprep.subr.bf16.mxu1 %v631_v0  ;;  %485 = vmatpush3.bf16.msra.mxu0 %v522_v14 }
  0x58   :  { %486 = vmatprep.subr.bf16.mxu0 %v631_v0 }
  0x5a   :  { %469 = vmatpush3.bf16.msra.mxu1 %v516_v8 }
  0x5b   :  { %470 = vmatprep.subr.bf16.mxu1 %v631_v0  ;;  %487 = vmatpush3.bf16.msra.mxu0 %v523_v15 }
  0x5c   :  { %488 = vmatprep.subr.bf16.mxu0 %v631_v0 }
  0x5e   :  { %471 = vmatpush3.bf16.msra.mxu1 %v517_v9 }
  0x5f   :  { %472 = vmatprep.subr.bf16.mxu1 %v631_v0  ;;  %489 = vmatpush3.bf16.msra.mxu0 %v524_v16 }
  0x60   :  { %490 = vmatprep.subr.bf16.mxu0 %v631_v0 }
  0x62   :  { %473 = vmatpush3.bf16.msra.mxu1 %v518_v10 }
  0x63   :  { %474 = vmatprep.subr.bf16.mxu1 %v631_v0  ;;  %491 = vmatpush3.bf16.msra.mxu0 %v525_v17 }
  0x64   :  { %492 = vmatprep.subr.bf16.mxu0 %v631_v0 }
  0x66   :  { %475 = vmatpush3.bf16.msra.mxu1 %v519_v11 }
  0x67   :  { %476 = vmatprep.subr.bf16.mxu1 %v631_v0  ;;  %493 = vmatpush3.bf16.msra.mxu0 %v526_v18 }
  0x68   :  { %494 = vmatprep.subr.bf16.mxu0 %v631_v0 }
  0x6a   :  { %477 = vmatpush3.bf16.msra.mxu1 %v520_v12 }
  0x6b   :  { %495 = vmatpush3.bf16.msra.mxu0 %v527_v29 }
  0x6c   :  { %496 = vmatprep.subr.bf16.mxu0 %v631_v0 }
  0x6f   :  { %497 = vmatpush3.bf16.msra.mxu0 %v528_v30 }
 0x124   :  { %v138_v20 = vpop.f32.mrb[0].mxu0 }
 0x125   :  { %v139_v21 = vadd.f32 %v415_v19, %v138_v20  ;;  %v460_v22 = vpop.f32.mrb[1].mxu0 }
 0x126   :  { %v141_v23 = vpop.f32.mrb[2].mxu0 }
 0x127   :  { %v142_v24 = vadd.f32 %v415_v19, %v141_v23  ;;  %v461_v25 = vpop.f32.mrb[3].mxu0  ;;  %v145_v26 = vmax.f32 %v139_v21, 0.0 }
 0x129   :  { %v146_v27 = vmax.f32 %v142_v24, 0.0 }
 0x12b   :  { %v147_v28 = vpack.c.bf16 %v146_v27, %v145_v26 }
 0x12d   :  { %479 = vmatmul.mubr.bf16.vlgmr.msra.gmra.mrb[0].mxu1 %v147_v28 }
 0x200   :  { %v253_v32 = vpop.f32.mrb[0].mxu1 }
 0x201   :  { %v254_v33 = vadd.f32 %v418_v31, %v253_v32  ;;  %v480_v34 = vpop.f32.mrb[1].mxu1 }
 0x202   :  { %v256_v35 = vpop.f32.mrb[2].mxu1 }
 0x203   :  { %v257_v36 = vadd.f32 %v418_v31, %v256_v35  ;;  %v481_v37 = vpop.f32.mrb[3].mxu1  ;;  %v260_v38 = vmax.f32 %v254_v33, 0.0 }
 0x205   :  { %v261_v39 = vmax.f32 %v257_v36, 0.0 }
 0x207   :  { %v262_v40 = vpack.c.bf16 %v261_v39, %v260_v38 }
 0x209   :  { %499 = vmatmul.mubr.bf16.vlgmr.msra.gmra.mrb[4].mxu0 %v262_v40 }
 0x2dc   :  { %v368_v42 = vpop.f32.mrb[4].mxu0 }
 0x2dd   :  { %v500_v43 = vpop.f32.mrb[5].mxu0  ;;  %v369_v44 = vadd.f32 %v427_v41, %v368_v42 }
 0x2de   :  { %v371_v45 = vpop.f32.mrb[6].mxu0 }
 0x2df   :  { %375 = vxpose.xlu0.b32.start [1/2] (short) (narrow) %v369_v44, 8  ;;  %v501_v46 = vpop.f32.mrb[7].mxu0  ;;  %v372_v47 = vadd.f32 %v427_v41, %v371_v45 }
 0x2e3   :  { %376 = vxpose.xlu0.b32.end [2/2] (short) (narrow) %v372_v47, 8 }
 0x35f   :  { %v391_v48 = vpop.trf.xlu0 }
 0x360   :  { %407 = vst.msk [vmem:[%s781_s7] sm:$0xff] %vm100_vm1, %v391_v48 }
 0x361   :  { %412 = vsyncpa [#allocation3], 1 }
 0x362   :  { %413 = vsyncpa [#allocation5], 1 }
 0x363   :  { %414 = vsyncpa [#allocation8], 1 }

</bundles_post_ra>
